<compile_context>
chip_gen: v5e
topology: v5e:2x2
jax: 0.10.0
libtpu: 0.0.40
codegen_flags: <defaults>
</compile_context>

<pallas_src>
import functools

import jax
import jax.numpy as jnp
from jax.experimental import pallas as pl
from jax.experimental.pallas import tpu as pltpu

_LANE = 128     # vreg lane width: last-dim padding target
_SUBLANE = 8    # vreg sublane width: batch-tile granularity


def _round_up(n, m):
    return ((n + m - 1) // m) * m


def _disc_kernel(x_ref, w1_ref, b1_ref, w2_ref, b2_ref, w3_ref, b3_ref, o_ref):
    """relu(x@W1 + b1) @ W2' + b2' -> relu -> @ W3' + b3'.
    Eval-mode BN is pre-folded into W2'/b2' and W3'/b3'.
    Matmuls are bf16-fed with f32 accumulation; elementwise work stays f32."""
    h = jnp.dot(x_ref[...], w1_ref[...],
                preferred_element_type=jnp.float32) + b1_ref[...]
    h = jnp.maximum(h, 0.0)
    h = jnp.dot(h.astype(w2_ref.dtype), w2_ref[...],
                preferred_element_type=jnp.float32) + b2_ref[...]
    h = jnp.maximum(h, 0.0)
    o_ref[...] = (jnp.dot(h.astype(w3_ref.dtype), w3_ref[...],
                          preferred_element_type=jnp.float32)
                  + b3_ref[...]).astype(o_ref.dtype)


def _fold_pad_cast_params(params):
    """Fold eval BN into the following Linear, zero-pad feature dims to 128
    lanes, cast matmul weights to bf16 (biases stay f32)."""
    (w1t, b1, s1, t1, w2t, b2, s2, t2, w3t, b3) = params
    F, H = w1t.shape
    C = w3t.shape[1]

    # (relu(z)*s + t) @ W + b == relu(z) @ (s.T*W) + (t@W + b)
    w2f = s1.reshape(H, 1) * w2t
    b2f = t1 @ w2t + b2
    w3f = s2.reshape(H, 1) * w3t
    b3f = t2 @ w3t + b3

    Fp, Hp, Cp = (_round_up(d, _LANE) for d in (F, H, C))

    def pad2(a, rows, cols):
        return jnp.pad(a, ((0, rows - a.shape[0]), (0, cols - a.shape[1])))

    prepped = (
        pad2(w1t, Fp, Hp).astype(jnp.bfloat16),
        pad2(b1, 1, Hp).astype(jnp.float32),
        pad2(w2f, Hp, Hp).astype(jnp.bfloat16),
        pad2(b2f, 1, Hp).astype(jnp.float32),
        pad2(w3f, Hp, Cp).astype(jnp.bfloat16),
        pad2(b3f, 1, Cp).astype(jnp.float32),
    )
    return prepped, (F, H, C, Fp, Hp, Cp)


def domain_discriminator_forward(x, params, *, tile_b=512):
    """x: (B, input_size) float32 -> (B, num_classes) float32."""
    prepped, (F, H, C, Fp, Hp, Cp) = _fold_pad_cast_params(params)
    w1p, b1p, w2p, b2p, w3p, b3p = prepped

    B = x.shape[0]
    tile_b = max(_SUBLANE, min(tile_b, _round_up(B, _SUBLANE)))
    Bp = _round_up(B, tile_b)
    # bf16 x stream halves the dominant HBM read traffic.
    xp = jnp.pad(x, ((0, Bp - B), (0, Fp - F))).astype(jnp.bfloat16)

    grid = (Bp // tile_b,)
    const = lambda i: (0, 0)   # weights/biases: resident block across all steps

    flops = 2 * Bp * (Fp * Hp + Hp * Hp + Hp * Cp)
    bytes_accessed = (xp.size * xp.dtype.itemsize
                      + Bp * Cp * 4
                      + sum(a.size * a.dtype.itemsize for a in prepped))

    out = pl.pallas_call(
        _disc_kernel,
        out_shape=jax.ShapeDtypeStruct((Bp, Cp), jnp.float32),
        grid=grid,
        in_specs=[
            pl.BlockSpec((tile_b, Fp), lambda i: (i, 0)),   # x: streamed per tile
            pl.BlockSpec((Fp, Hp), const),
            pl.BlockSpec((1, Hp), const),
            pl.BlockSpec((Hp, Hp), const),
            pl.BlockSpec((1, Hp), const),
            pl.BlockSpec((Hp, Cp), const),
            pl.BlockSpec((1, Cp), const),
        ],
        out_specs=pl.BlockSpec((tile_b, Cp), lambda i: (i, 0)),
        compiler_params=pltpu.CompilerParams(
            dimension_semantics=("parallel",),          # megacore-shard batch tiles
            vmem_limit_bytes=32 * 1024 * 1024),
        cost_estimate=pl.CostEstimate(flops=flops, transcendentals=0,
                                      bytes_accessed=bytes_accessed),
    )(xp, w1p, b1p, w2p, b2p, w3p, b3p)
    return out[:B, :C]


def init_params(key, input_size, hidden_size, num_classes, eps=1e-5):
    """Deterministic PyTorch-style init; BN (eval) stats pre-folded to scale/shift."""
    ks = jax.random.split(key, 14)

    def linear(kw, kb, fan_in, fan_out):
        bound = fan_in ** -0.5
        w = jax.random.uniform(kw, (fan_out, fan_in), jnp.float32, -bound, bound)
        b = jax.random.uniform(kb, (1, fan_out), jnp.float32, -bound, bound)
        return w.T, b  # pre-transposed to (in, out)

    def bn_fold(kg, kb2, km, kv, dim):
        gamma = 1.0 + 0.1 * jax.random.normal(kg, (1, dim), jnp.float32)
        beta = 0.1 * jax.random.normal(kb2, (1, dim), jnp.float32)
        rmean = 0.1 * jax.random.normal(km, (1, dim), jnp.float32)
        rvar = jnp.abs(jax.random.normal(kv, (1, dim), jnp.float32)) + 0.5
        scale = gamma / jnp.sqrt(rvar + eps)
        shift = beta - rmean * scale
        return scale, shift

    w1t, b1 = linear(ks[0], ks[1], input_size, hidden_size)
    s1, t1 = bn_fold(ks[2], ks[3], ks[4], ks[5], hidden_size)
    w2t, b2 = linear(ks[6], ks[7], hidden_size, hidden_size)
    s2, t2 = bn_fold(ks[8], ks[9], ks[10], ks[11], hidden_size)
    w3t, b3 = linear(ks[12], ks[13], hidden_size, num_classes)
    return (w1t, b1, s1, t1, w2t, b2, s2, t2, w3t, b3)


def reference_forward(x, params):
    """Pure-JAX f32 reference with the module's semantics:
    Linear -> ReLU -> BN(eval), Linear -> ReLU -> BN(eval), Linear."""
    (w1t, b1, s1, t1, w2t, b2, s2, t2, w3t, b3) = params
    h = jnp.maximum(x @ w1t + b1, 0.0) * s1 + t1
    h = jnp.maximum(h @ w2t + b2, 0.0) * s2 + t2
    return h @ w3t + b3


if __name__ == "__main__":
    B, INPUT_SIZE, HIDDEN_SIZE, NUM_CLASSES = 64, 32, 32, 4
    key = jax.random.PRNGKey(0)
    kx, kp = jax.random.split(key)
    x = jax.random.normal(kx, (B, INPUT_SIZE), jnp.float32)
    params = init_params(kp, INPUT_SIZE, HIDDEN_SIZE, NUM_CLASSES)

    fwd = jax.jit(functools.partial(domain_discriminator_forward, tile_b=32))
    out = jax.block_until_ready(fwd(x, params))

    ref = reference_forward(x, params)
    assert out.shape == (B, NUM_CLASSES)
    # bf16-fed MXU with f32 accumulation -> loosened tolerance vs. f32 reference.
    max_err = float(jnp.max(jnp.abs(out - ref)))
    assert jnp.allclose(out, ref, atol=5e-2, rtol=5e-2), f"max abs err {max_err}"
    print("KERNEL_OK")
</pallas_src>

<mosaic_0001>
module attributes {stable_mosaic.version = 11 : i64} {
  func.func @_disc_kernel(%arg0: i32, %arg1: memref<32x128xbf16, #tpu.memory_space<vmem>>, %arg2: memref<128x128xbf16, #tpu.memory_space<vmem>>, %arg3: memref<1x128xf32, #tpu.memory_space<vmem>>, %arg4: memref<128x128xbf16, #tpu.memory_space<vmem>>, %arg5: memref<1x128xf32, #tpu.memory_space<vmem>>, %arg6: memref<128x128xbf16, #tpu.memory_space<vmem>>, %arg7: memref<1x128xf32, #tpu.memory_space<vmem>>, %arg8: memref<32x128xf32, #tpu.memory_space<vmem>>) attributes {dimension_semantics = [#tpu.dimension_semantics<parallel>], iteration_bounds = array<i64: 2>, scalar_prefetch = 0 : i64, scratch_operands = 0 : i64, tpu.core_type = #tpu.core_type<tc>, window_params = [{transform_indices = @transform_0, window_bounds = array<i64: 32, 128>}, {pipeline_mode = #tpu.pipeline_mode<synchronous>, transform_indices = @transform_1, window_bounds = array<i64: 128, 128>}, {pipeline_mode = #tpu.pipeline_mode<synchronous>, transform_indices = @transform_2, window_bounds = array<i64: 1, 128>}, {pipeline_mode = #tpu.pipeline_mode<synchronous>, transform_indices = @transform_3, window_bounds = array<i64: 128, 128>}, {pipeline_mode = #tpu.pipeline_mode<synchronous>, transform_indices = @transform_4, window_bounds = array<i64: 1, 128>}, {pipeline_mode = #tpu.pipeline_mode<synchronous>, transform_indices = @transform_5, window_bounds = array<i64: 128, 128>}, {pipeline_mode = #tpu.pipeline_mode<synchronous>, transform_indices = @transform_6, window_bounds = array<i64: 1, 128>}, {transform_indices = @transform_7, window_bounds = array<i64: 32, 128>}]} {
    %c0 = arith.constant 0 : index
    %c0_0 = arith.constant 0 : index
    %0 = vector.load %arg1[%c0, %c0_0] : memref<32x128xbf16, #tpu.memory_space<vmem>>, vector<32x128xbf16>
    %c0_1 = arith.constant 0 : index
    %c0_2 = arith.constant 0 : index
    %1 = vector.load %arg2[%c0_1, %c0_2] : memref<128x128xbf16, #tpu.memory_space<vmem>>, vector<128x128xbf16>
    %cst = arith.constant dense<0.000000e+00> : vector<32x128xf32>
    %2 = tpu.matmul %0, %1, %cst {dimension_numbers = #tpu.dot_dimension_numbers<[1], [0], [0], [1], [0, 0, 1, 1], [], []>} : vector<32x128xbf16>, vector<128x128xbf16>, vector<32x128xf32> -> vector<32x128xf32>
    %c0_3 = arith.constant 0 : index
    %c0_4 = arith.constant 0 : index
    %3 = vector.load %arg3[%c0_3, %c0_4] : memref<1x128xf32, #tpu.memory_space<vmem>>, vector<1x128xf32>
    %4 = vector.broadcast %3 : vector<1x128xf32> to vector<32x128xf32>
    %5 = arith.addf %2, %4 : vector<32x128xf32>
    %cst_5 = arith.constant 0.000000e+00 : f32
    %6 = vector.broadcast %cst_5 : f32 to vector<32x128xf32>
    %7 = arith.maximumf %5, %6 : vector<32x128xf32>
    %8 = arith.truncf %7 : vector<32x128xf32> to vector<32x128xbf16>
    %c0_6 = arith.constant 0 : index
    %c0_7 = arith.constant 0 : index
    %9 = vector.load %arg4[%c0_6, %c0_7] : memref<128x128xbf16, #tpu.memory_space<vmem>>, vector<128x128xbf16>
    %cst_8 = arith.constant dense<0.000000e+00> : vector<32x128xf32>
    %10 = tpu.matmul %8, %9, %cst_8 {dimension_numbers = #tpu.dot_dimension_numbers<[1], [0], [0], [1], [0, 0, 1, 1], [], []>} : vector<32x128xbf16>, vector<128x128xbf16>, vector<32x128xf32> -> vector<32x128xf32>
    %c0_9 = arith.constant 0 : index
    %c0_10 = arith.constant 0 : index
    %11 = vector.load %arg5[%c0_9, %c0_10] : memref<1x128xf32, #tpu.memory_space<vmem>>, vector<1x128xf32>
    %12 = vector.broadcast %11 : vector<1x128xf32> to vector<32x128xf32>
    %13 = arith.addf %10, %12 : vector<32x128xf32>
    %cst_11 = arith.constant 0.000000e+00 : f32
    %14 = vector.broadcast %cst_11 : f32 to vector<32x128xf32>
    %15 = arith.maximumf %13, %14 : vector<32x128xf32>
    %16 = arith.truncf %15 : vector<32x128xf32> to vector<32x128xbf16>
    %c0_12 = arith.constant 0 : index
    %c0_13 = arith.constant 0 : index
    %17 = vector.load %arg6[%c0_12, %c0_13] : memref<128x128xbf16, #tpu.memory_space<vmem>>, vector<128x128xbf16>
    %cst_14 = arith.constant dense<0.000000e+00> : vector<32x128xf32>
    %18 = tpu.matmul %16, %17, %cst_14 {dimension_numbers = #tpu.dot_dimension_numbers<[1], [0], [0], [1], [0, 0, 1, 1], [], []>} : vector<32x128xbf16>, vector<128x128xbf16>, vector<32x128xf32> -> vector<32x128xf32>
    %c0_15 = arith.constant 0 : index
    %c0_16 = arith.constant 0 : index
    %19 = vector.load %arg7[%c0_15, %c0_16] : memref<1x128xf32, #tpu.memory_space<vmem>>, vector<1x128xf32>
    %20 = vector.broadcast %19 : vector<1x128xf32> to vector<32x128xf32>
    %21 = arith.addf %18, %20 : vector<32x128xf32>
    %c0_17 = arith.constant 0 : index
    %c0_18 = arith.constant 0 : index
    %22 = vector.load %arg8[%c0_17, %c0_18] : memref<32x128xf32, #tpu.memory_space<vmem>>, vector<32x128xf32>
    tpu.vector_store %arg8[%c0_17, %c0_18], %21 {strides = array<i32>} : memref<32x128xf32, #tpu.memory_space<vmem>>, vector<32x128xf32>,
    return
  }
  func.func @transform_0(%arg0: i32) -> (i32, i32) {
    %c0_i32 = arith.constant 0 : i32
    %c0_i32_0 = arith.constant 0 : i32
    return %arg0, %c0_i32 : i32, i32
  }
  func.func @transform_1(%arg0: i32) -> (i32, i32) {
    %c0_i32 = arith.constant 0 : i32
    %c0_i32_0 = arith.constant 0 : i32
    %c0_i32_1 = arith.constant 0 : i32
    return %c0_i32, %c0_i32_0 : i32, i32
  }
  func.func @transform_2(%arg0: i32) -> (i32, i32) {
    %c0_i32 = arith.constant 0 : i32
    %c0_i32_0 = arith.constant 0 : i32
    %c0_i32_1 = arith.constant 0 : i32
    return %c0_i32, %c0_i32_0 : i32, i32
  }
  func.func @transform_3(%arg0: i32) -> (i32, i32) {
    %c0_i32 = arith.constant 0 : i32
    %c0_i32_0 = arith.constant 0 : i32
    %c0_i32_1 = arith.constant 0 : i32
    return %c0_i32, %c0_i32_0 : i32, i32
  }
  func.func @transform_4(%arg0: i32) -> (i32, i32) {
    %c0_i32 = arith.constant 0 : i32
    %c0_i32_0 = arith.constant 0 : i32
    %c0_i32_1 = arith.constant 0 : i32
    return %c0_i32, %c0_i32_0 : i32, i32
  }
  func.func @transform_5(%arg0: i32) -> (i32, i32) {
    %c0_i32 = arith.constant 0 : i32
    %c0_i32_0 = arith.constant 0 : i32
    %c0_i32_1 = arith.constant 0 : i32
    return %c0_i32, %c0_i32_0 : i32, i32
  }
  func.func @transform_6(%arg0: i32) -> (i32, i32) {
    %c0_i32 = arith.constant 0 : i32
    %c0_i32_0 = arith.constant 0 : i32
    %c0_i32_1 = arith.constant 0 : i32
    return %c0_i32, %c0_i32_0 : i32, i32
  }
  func.func @transform_7(%arg0: i32) -> (i32, i32) {
    %c0_i32 = arith.constant 0 : i32
    %c0_i32_0 = arith.constant 0 : i32
    return %arg0, %c0_i32 : i32, i32
  }
}

</mosaic_0001>

<bundles_post_ra>
// kernel: domain_discriminator_forward.1
= control target key start
LH: loop header
LB: loop body
LE: loop exit
PB: predicated region body
PF: predicated region fallthrough
CT: control target
= control target key end

     0   :  { %s839_s24 = smov 0   ;;  %s941_s0 = inlined_call_operand.vmem [shape: bf16[64,128], index: 0, kind: input, shape index: {}]   ;;  %s942_s1 = inlined_call_operand.vmem [shape: bf16[128,128], index: 1, kind: input, shape index: {}]   ;;  %s943_s2 = inlined_call_operand.vmem [shape: f32[1,128], index: 2, kind: input, shape index: {}]   ;;  %s944_s3 = inlined_call_operand.vmem [shape: bf16[128,128], index: 3, kind: input, shape index: {}]   ;;  %s945_s4 = inlined_call_operand.vmem [shape: f32[1,128], index: 4, kind: input, shape index: {}]   ;;  %s946_s5 = inlined_call_operand.vmem [shape: bf16[128,128], index: 5, kind: input, shape index: {}]   ;;  %s947_s6 = inlined_call_operand.vmem [shape: f32[1,128], index: 6, kind: input, shape index: {}]   ;;  %s948_s7 = inlined_call_operand.vmem [shape: f32[64,128], index: 7, kind: output, shape index: {}]  }
   0x1 LB: > { %s631_s25 = sadd.s32 4294967295, %s797_s24   ;;  %p635_p0 = scmp.ge.s32.totalorder %s797_s24, 1  ;;  %s797_s24 = sphi %s839_s24, %s17_s24  }
   0x2   : > { %p238_p1 = scmp.lt.s32.totalorder %s797_s24, 3 }
   0x4   : > { %p239_p2 = pnand %p635_p0, %p238_p1 }
   0x5   : > { %s636_s17 = sshll.u32 (!%p239_p2), %s631_s25, 2 }
   0x6   : > { %242 = sbr.rel (%p239_p2) target bundleno = 482 (0x1e2), region = 48  ;;  %p271_p3 = scmp.lt.s32.totalorder (!%p239_p2), %s636_s17, 7 }
   0xb   : > { %v755_v0 = vld [vmem:[%s942_s1 + $0x38] sm:$0xff]  ;;  %v754_v1 = vld [vmem:[%s942_s1 + $0x30] sm:$0xff]  ;;  %v753_v4 = vld [vmem:[%s942_s1 + $0x28] sm:$0xff]  ;;  %s950_s17 = smov (!%p271_p3, %s636_s17), 7 }
   0xc   : > { %366 = vmatpush.bf16.msra.mxu0 %v755_v0  ;;  %772 = vmatpush.bf16.msra.mxu3 %v755_v0  ;;  %v763_v2 = vld [vmem:[%s944_s3 + $0x38] sm:$0xff]  ;;  %v762_v3 = vld [vmem:[%s944_s3 + $0x30] sm:$0xff]  ;;  %v761_v5 = vld [vmem:[%s944_s3 + $0x28] sm:$0xff]  ;;  %s637_s27 = sshll.u32 %s950_s17, 2  ;;  %s639_s18 = sshll.u32 %s950_s17, 3 }
   0xd   : > { %459 = vmatpush.bf16.msra.mxu1 %v763_v2  ;;  %v752_v6 = vld [vmem:[%s942_s1 + $0x20] sm:$0xff]  ;;  %v751_v8 = vld [vmem:[%s942_s1 + $0x18] sm:$0xff]  ;;  %v750_v9 = vld [vmem:[%s942_s1 + $0x10] sm:$0xff]  ;;  %s274_s9 = scalar_lea.vmem %s941_s0, %s637_s27  ;;  %s280_s23 = scalar_lea.vmem %s948_s7, %s639_s18 }
   0xe   : > { %v760_v7 = vld [vmem:[%s944_s3 + $0x20] sm:$0xff]  ;;  %v749_v10 = vld [vmem:[%s942_s1 + $0x8] sm:$0xff]  ;;  %v759_v14 = vld [vmem:[%s944_s3 + $0x18] sm:$0xff] }
   0xf   : > { %v748_v11 = vld [vmem:[%s942_s1] sm:$0xff]  ;;  %v747_v13 = vld [vmem:[%s274_s9 + $0x8] sm:$0xff]  ;;  %v758_v15 = vld [vmem:[%s944_s3 + $0x10] sm:$0xff] }
  0x10   : > { %367 = vmatpush.bf16.msra.mxu0 %v754_v1  ;;  %773 = vmatpush.bf16.msra.mxu3 %v754_v1  ;;  %v746_v12 = vld [vmem:[%s274_s9] sm:$0xff]  ;;  %v757_v16 = vld [vmem:[%s944_s3 + $0x8] sm:$0xff]  ;;  %v771_v18 = vld [vmem:[%s946_s5 + $0x38] sm:$0xff] }
  0x11   : > { %460 = vmatpush.bf16.msra.mxu1 %v762_v3  ;;  %v756_v17 = vld [vmem:[%s944_s3] sm:$0xff]  ;;  %552 = vmatpush.bf16.msra.mxu2 %v771_v18  ;;  %v770_v20 = vld [vmem:[%s946_s5 + $0x30] sm:$0xff]  ;;  %v769_v22 = vld [vmem:[%s946_s5 + $0x28] sm:$0xff] }
  0x12   : > { %v788_v21 = vld [vmem:[%s943_s2] ss:$0 sm:$0xff]  ;;  %v767_v37 = vld [vmem:[%s946_s5 + $0x18] sm:$0xff]  ;;  %v766_v38 = vld [vmem:[%s946_s5 + $0x10] sm:$0xff] }
  0x13   : > { %v768_v27 = vld [vmem:[%s946_s5 + $0x20] sm:$0xff]  ;;  %v765_v39 = vld [vmem:[%s946_s5 + $0x8] sm:$0xff] }
  0x14   : > { %368 = vmatpush.bf16.msra.mxu0 %v753_v4  ;;  %774 = vmatpush.bf16.msra.mxu3 %v753_v4  ;;  %v764_v40 = vld [vmem:[%s946_s5] sm:$0xff] }
  0x15   : > { %461 = vmatpush.bf16.msra.mxu1 %v761_v5  ;;  %553 = vmatpush.bf16.msra.mxu2 %v770_v20  ;;  %v789_v42 = vld [vmem:[%s945_s4] ss:$0 sm:$0xff] }
  0x16   : > { %v790_v56 = vld [vmem:[%s947_s6] ss:$0 sm:$0xff] }
  0x18   : > { %369 = vmatpush.bf16.msra.mxu0 %v752_v6  ;;  %775 = vmatpush.bf16.msra.mxu3 %v752_v6 }
  0x19   : > { %462 = vmatpush.bf16.msra.mxu1 %v760_v7  ;;  %554 = vmatpush.bf16.msra.mxu2 %v769_v22 }
  0x1c   : > { %370 = vmatpush.bf16.msra.mxu0 %v751_v8  ;;  %776 = vmatpush.bf16.msra.mxu3 %v751_v8 }
  0x1d   : > { %463 = vmatpush.bf16.msra.mxu1 %v759_v14  ;;  %555 = vmatpush.bf16.msra.mxu2 %v768_v27 }
  0x20   : > { %371 = vmatpush.bf16.msra.mxu0 %v750_v9  ;;  %777 = vmatpush.bf16.msra.mxu3 %v750_v9 }
  0x21   : > { %464 = vmatpush.bf16.msra.mxu1 %v758_v15  ;;  %556 = vmatpush.bf16.msra.mxu2 %v767_v37 }
  0x24   : > { %372 = vmatpush.bf16.msra.mxu0 %v749_v10  ;;  %778 = vmatpush.bf16.msra.mxu3 %v749_v10 }
  0x25   : > { %465 = vmatpush.bf16.msra.mxu1 %v757_v16  ;;  %557 = vmatpush.bf16.msra.mxu2 %v766_v38 }
  0x28   : > { %373 = vmatpush.bf16.msra.mxu0 %v748_v11  ;;  %779 = vmatpush.bf16.msra.mxu3 %v748_v11 }
  0x29   : > { %466 = vmatpush.bf16.msra.mxu1 %v756_v17  ;;  %558 = vmatpush.bf16.msra.mxu2 %v765_v39 }
  0x2b   : > { %374 = vmatmul.bf16.vlgmr.msra.gmra.mxu0 %v746_v12  ;;  %379 = vmatmul.bf16.vlgmr.msra.gmra.mxu3 %v747_v13 }
  0x2d   : > { %559 = vmatpush.bf16.msra.mxu2 %v764_v40 }
  0xa8   : > { %v375_v19 = vpop.f32.mrf.mxu0 }
  0xa9   : > { %v376_v23 = vadd.f32 %v788_v21, %v375_v19 }
  0xab   : > { %v385_v28 = vmax.f32 %v376_v23, 0.0 }
  0xae   : > { %v380_v25 = vpop.f32.mrf.mxu3 }
  0xaf   : > { %v381_v32 = vadd.f32 %v788_v21, %v380_v25 }
  0xb0   : > { %v377_v24 = vpop.f32.mrf.mxu0 }
  0xb1   : > { %v378_v26 = vadd.f32 %v788_v21, %v377_v24  ;;  %v387_v34 = vmax.f32 %v381_v32, 0.0 }
  0xb3   : > { %v386_v29 = vmax.f32 %v378_v26, 0.0 }
  0xb5   : > { %v389_v30 = vpack.c.bf16 %v386_v29, %v385_v28 }
  0xb6   : > { %v382_v31 = vpop.f32.mrf.mxu3 }
  0xb7   : > { %467 = vmatmul.bf16.vlgmr.msra.gmra.mxu1 %v389_v30  ;;  %v383_v33 = vadd.f32 %v788_v21, %v382_v31 }
  0xb9   : > { %v388_v35 = vmax.f32 %v383_v33, 0.0 }
  0xbb   : > { %v390_v36 = vpack.c.bf16 %v388_v35, %v387_v34 }
  0xc7   : > { %472 = vmatmul.bf16.gmra.mxu1 %v390_v36 }
 0x134   : > { %v468_v41 = vpop.f32.mrf.mxu1 }
 0x135   : > { %v469_v43 = vadd.f32 %v789_v42, %v468_v41 }
 0x137   : > { %v478_v46 = vmax.f32 %v469_v43, 0.0 }
 0x13c   : > { %v470_v44 = vpop.f32.mrf.mxu1 }
 0x13d   : > { %v471_v45 = vadd.f32 %v789_v42, %v470_v44 }
 0x13f   : > { %v479_v47 = vmax.f32 %v471_v45, 0.0 }
 0x141   : > { %v482_v48 = vpack.c.bf16 %v479_v47, %v478_v46 }
 0x143   : > { %560 = vmatmul.bf16.vlgmr.msra.gmra.mxu2 %v482_v48 }
 0x144   : > { %v473_v49 = vpop.f32.mrf.mxu1 }
 0x145   : > { %v474_v50 = vadd.f32 %v789_v42, %v473_v49 }
 0x147   : > { %v480_v53 = vmax.f32 %v474_v50, 0.0 }
 0x14c   : > { %v475_v51 = vpop.f32.mrf.mxu1 }
 0x14d   : > { %v476_v52 = vadd.f32 %v789_v42, %v475_v51 }
 0x14f   : > { %v481_v54 = vmax.f32 %v476_v52, 0.0 }
 0x151   : > { %v483_v55 = vpack.c.bf16 %v481_v54, %v480_v53 }
 0x153   : > { %565 = vmatmul.bf16.gmra.mxu2 %v483_v55 }
 0x1c6   : > { %v561_v57 = vpop.f32.mrf.mxu2 }
 0x1c7   : > { %v562_v58 = vadd.f32 %v790_v56, %v561_v57 }
 0x1c9   : > { %571 = vst [vmem:[%s280_s23] sm:$0xff] %v562_v58 }
 0x1ce   : > { %v563_v59 = vpop.f32.mrf.mxu2 }
 0x1cf   : > { %v564_v60 = vadd.f32 %v790_v56, %v563_v59 }
 0x1d1   : > { %572 = vst [vmem:[%s280_s23 + $0x8] sm:$0xff] %v564_v60 }
 0x1d6   : > { %v566_v61 = vpop.f32.mrf.mxu2 }
 0x1d7   : > { %v567_v62 = vadd.f32 %v790_v56, %v566_v61 }
 0x1d9   : > { %573 = vst [vmem:[%s280_s23 + $0x10] sm:$0xff] %v567_v62 }
 0x1de   : > { %v568_v63 = vpop.f32.mrf.mxu2 }
 0x1df   : > { %v569_v0 = vadd.f32 %v790_v56, %v568_v63 }
 0x1e1   : > { %574 = vst [vmem:[%s280_s23 + $0x18] sm:$0xff] %v569_v0 }
 0x1e2 PF: > { %s17_s24 = sadd.s32 1, %s797_s24  }
 0x1e3   : > { %p14_p4 = scmp.ge.s32.totalorder %s17_s24, 4  }
 0x1e5   :  { %16 = sbr.rel (!%p14_p4) target bundleno = 1 (0x1), region = 78 }

</bundles_post_ra>
